<compile_context>
chip_gen: v6e
topology: v6e:2x2x1
jax: 0.10.0
libtpu: 0.0.40
codegen_flags: <defaults>
</compile_context>

<pallas_src>
import jax
import jax.numpy as jnp
from jax import lax
from jax.experimental import pallas as pl
from jax.experimental.pallas import tpu as pltpu

_LANES = 128


def _classifier_kernel(conj_ref, prem_ref, w1a_ref, w1b_ref, w2_ref, p_ref, o_ref):
    eps = 1e-5
    inv_b = 1.0 / conj_ref.shape[0]          # static batch size of this block

    # Packed per-feature params: rows = [gamma1, beta1, gamma2, beta2], lane-padded with 0.
    g1 = p_ref[0:1, :]
    beta1 = p_ref[1:2, :]
    g2 = p_ref[2:3, :]
    beta2 = p_ref[3:4, :]

    # --- MLPBlock 1: Linear(4C -> C) split over K (replaces the concat) + BN + ReLU ---
    h = jnp.dot(conj_ref[...], w1a_ref[...], preferred_element_type=jnp.float32)
    h = h + jnp.dot(prem_ref[...], w1b_ref[...], preferred_element_type=jnp.float32)
    # (linear bias omitted: cancelled exactly by the batch-mean subtraction below)
    mu1 = jnp.sum(h, axis=0, keepdims=True) * inv_b
    var1 = jnp.sum(h * h, axis=0, keepdims=True) * inv_b - mu1 * mu1
    scale1 = lax.rsqrt(var1 + eps) * g1                      # folded BN scale, [1, CP]
    h = jnp.maximum((h - mu1) * scale1 + beta1, 0.0)

    # --- MLPBlock 2: Linear(C -> 2) + BN (identity activation) ---
    y = jnp.dot(h, w2_ref[...], preferred_element_type=jnp.float32)
    mu2 = jnp.sum(y, axis=0, keepdims=True) * inv_b
    var2 = jnp.sum(y * y, axis=0, keepdims=True) * inv_b - mu2 * mu2
    scale2 = lax.rsqrt(var2 + eps) * g2
    o_ref[...] = ((y - mu2) * scale2 + beta2).astype(o_ref.dtype)


def classifier_forward(conj_batch, prem_batch, params):
    """conj_batch, prem_batch: [B, 2*C] each. Returns [B, 2]."""
    w1, g1, beta1, w2, g2, beta2 = params
    B, f_half = conj_batch.shape            # f_half = 2*C_node... i.e. 2 * node_out_channels
    C = w1.shape[1]                          # hidden width (= node_out_channels)

    CP = max(_LANES, ((C + _LANES - 1) // _LANES) * _LANES)   # lane-padded hidden dim
    OP = _LANES                                               # lane-padded output dim (>= 2)
    PMAX = max(CP, OP)

    # Static weight prep (pre-split W1 over K, zero-pad narrow feature dims to 128 lanes).
    w1 = w1.astype(jnp.float32)
    w2 = w2.astype(jnp.float32)
    w1a = jnp.zeros((f_half, CP), jnp.float32).at[:, :C].set(w1[:f_half])
    w1b = jnp.zeros((f_half, CP), jnp.float32).at[:, :C].set(w1[f_half:])
    w2p = jnp.zeros((CP, OP), jnp.float32).at[:C, :2].set(w2)

    packed = jnp.zeros((4, PMAX), jnp.float32)
    packed = packed.at[0, :C].set(g1).at[1, :C].set(beta1)
    packed = packed.at[2, :2].set(g2).at[3, :2].set(beta2)

    def full_spec(shape):
        return pl.BlockSpec(shape, lambda i: tuple(0 for _ in shape))

    out = pl.pallas_call(
        _classifier_kernel,
        out_shape=jax.ShapeDtypeStruct((B, OP), jnp.float32),
        grid=(1,),
        in_specs=[
            full_spec((B, f_half)),      # conj
            full_spec((B, f_half)),      # prem
            full_spec((f_half, CP)),     # W1 top half (in x out, lane-padded)
            full_spec((f_half, CP)),     # W1 bottom half
            full_spec((CP, OP)),         # W2 (lane-padded both dims)
            full_spec((4, PMAX)),        # packed [gamma1; beta1; gamma2; beta2]
        ],
        out_specs=full_spec((B, OP)),
        compiler_params=pltpu.CompilerParams(
            dimension_semantics=("arbitrary",),
            vmem_limit_bytes=32 * 1024 * 1024,
        ),
    )(conj_batch.astype(jnp.float32), prem_batch.astype(jnp.float32),
      w1a, w1b, w2p, packed)

    return out[:, :2]


def init_params(key, node_out_channels):
    """Parameter init mirroring MLPBlock.reset_parameters().

    Linear biases are zero-initialized in the PyTorch module AND are mathematically
    cancelled by the training-mode BatchNorm that follows, so they are omitted here.
    """
    C = node_out_channels
    f_in1, f_out1 = 4 * C, C
    f_in2, f_out2 = C, 2
    k1, k2 = jax.random.split(key)

    # Layer 1: relu -> kaiming_normal_, std = sqrt(2 / fan_in)
    std1 = (2.0 / f_in1) ** 0.5
    w1 = std1 * jax.random.normal(k1, (f_in1, f_out1), dtype=jnp.float32)
    g1 = jnp.ones((f_out1,), dtype=jnp.float32)       # BatchNorm1d weight
    beta1 = jnp.zeros((f_out1,), dtype=jnp.float32)   # BatchNorm1d bias

    # Layer 2: identity activation -> xavier_normal_, std = sqrt(2/(fan_in+fan_out))
    std2 = (2.0 / (f_in2 + f_out2)) ** 0.5
    w2 = std2 * jax.random.normal(k2, (f_in2, f_out2), dtype=jnp.float32)
    g2 = jnp.ones((f_out2,), dtype=jnp.float32)
    beta2 = jnp.zeros((f_out2,), dtype=jnp.float32)

    return (w1, g1, beta1, w2, g2, beta2)


def reference_forward(conj_batch, prem_batch, params):
    """Pure-JAX reference mirroring the PyTorch module (training-mode BN, B > 1)."""
    w1, g1, beta1, w2, g2, beta2 = params
    eps = 1e-5
    x = jnp.concatenate([conj_batch, prem_batch], axis=1)
    h = x @ w1
    mu = h.mean(0, keepdims=True)
    var = ((h - mu) ** 2).mean(0, keepdims=True)
    h = jnp.maximum((h - mu) / jnp.sqrt(var + eps) * g1[None, :] + beta1[None, :], 0.0)
    y = h @ w2
    mu = y.mean(0, keepdims=True)
    var = ((y - mu) ** 2).mean(0, keepdims=True)
    return (y - mu) / jnp.sqrt(var + eps) * g2[None, :] + beta2[None, :]


if __name__ == "__main__":
    node_out_channels = 32
    B = 8  # batch > 1 so the BatchNorm branch in MLPBlock.forward is active

    key = jax.random.PRNGKey(0)
    k_c, k_p, k_w = jax.random.split(key, 3)
    conj_batch = jax.random.normal(k_c, (B, 2 * node_out_channels), dtype=jnp.float32)
    prem_batch = jax.random.normal(k_p, (B, 2 * node_out_channels), dtype=jnp.float32)
    params = init_params(k_w, node_out_channels)

    out = classifier_forward(conj_batch, prem_batch, params)
    out = jax.block_until_ready(out)

    ref = reference_forward(conj_batch, prem_batch, params)
    assert out.shape == (B, 2)
    assert jnp.allclose(out, ref, atol=1e-4, rtol=1e-4), "mismatch vs JAX reference"

    print("KERNEL_OK")
</pallas_src>

<mosaic_0001>
module attributes {stable_mosaic.version = 11 : i64} {
  func.func @_classifier_kernel(%arg0: i32, %arg1: memref<8x64xf32, #tpu.memory_space<vmem>>, %arg2: memref<8x64xf32, #tpu.memory_space<vmem>>, %arg3: memref<64x128xf32, #tpu.memory_space<vmem>>, %arg4: memref<64x128xf32, #tpu.memory_space<vmem>>, %arg5: memref<128x128xf32, #tpu.memory_space<vmem>>, %arg6: memref<4x128xf32, #tpu.memory_space<vmem>>, %arg7: memref<8x128xf32, #tpu.memory_space<vmem>>) attributes {dimension_semantics = [#tpu.dimension_semantics<arbitrary>], iteration_bounds = array<i64: 1>, scalar_prefetch = 0 : i64, scratch_operands = 0 : i64, tpu.core_type = #tpu.core_type<tc>, window_params = [{pipeline_mode = #tpu.pipeline_mode<synchronous>, transform_indices = @transform_0, window_bounds = array<i64: 8, 64>}, {pipeline_mode = #tpu.pipeline_mode<synchronous>, transform_indices = @transform_1, window_bounds = array<i64: 8, 64>}, {pipeline_mode = #tpu.pipeline_mode<synchronous>, transform_indices = @transform_2, window_bounds = array<i64: 64, 128>}, {pipeline_mode = #tpu.pipeline_mode<synchronous>, transform_indices = @transform_3, window_bounds = array<i64: 64, 128>}, {pipeline_mode = #tpu.pipeline_mode<synchronous>, transform_indices = @transform_4, window_bounds = array<i64: 128, 128>}, {pipeline_mode = #tpu.pipeline_mode<synchronous>, transform_indices = @transform_5, window_bounds = array<i64: 4, 128>}, {pipeline_mode = #tpu.pipeline_mode<synchronous>, transform_indices = @transform_6, window_bounds = array<i64: 8, 128>}]} {
    %c0 = arith.constant 0 : index
    %c0_0 = arith.constant 0 : index
    %0 = vector.load %arg6[%c0, %c0_0] : memref<4x128xf32, #tpu.memory_space<vmem>>, vector<1x128xf32>
    %c1 = arith.constant 1 : index
    %c0_1 = arith.constant 0 : index
    %1 = vector.load %arg6[%c1, %c0_1] : memref<4x128xf32, #tpu.memory_space<vmem>>, vector<1x128xf32>
    %c2 = arith.constant 2 : index
    %c0_2 = arith.constant 0 : index
    %2 = vector.load %arg6[%c2, %c0_2] : memref<4x128xf32, #tpu.memory_space<vmem>>, vector<1x128xf32>
    %c3 = arith.constant 3 : index
    %c0_3 = arith.constant 0 : index
    %3 = vector.load %arg6[%c3, %c0_3] : memref<4x128xf32, #tpu.memory_space<vmem>>, vector<1x128xf32>
    %c0_4 = arith.constant 0 : index
    %c0_5 = arith.constant 0 : index
    %4 = vector.load %arg1[%c0_4, %c0_5] : memref<8x64xf32, #tpu.memory_space<vmem>>, vector<8x64xf32>
    %c0_6 = arith.constant 0 : index
    %c0_7 = arith.constant 0 : index
    %5 = vector.load %arg3[%c0_6, %c0_7] : memref<64x128xf32, #tpu.memory_space<vmem>>, vector<64x128xf32>
    %cst = arith.constant dense<0.000000e+00> : vector<8x128xf32>
    %6 = tpu.matmul %4, %5, %cst {dimension_numbers = #tpu.dot_dimension_numbers<[1], [0], [0], [1], [0, 0, 1, 1], [], []>} : vector<8x64xf32>, vector<64x128xf32>, vector<8x128xf32> -> vector<8x128xf32>
    %c0_8 = arith.constant 0 : index
    %c0_9 = arith.constant 0 : index
    %7 = vector.load %arg2[%c0_8, %c0_9] : memref<8x64xf32, #tpu.memory_space<vmem>>, vector<8x64xf32>
    %c0_10 = arith.constant 0 : index
    %c0_11 = arith.constant 0 : index
    %8 = vector.load %arg4[%c0_10, %c0_11] : memref<64x128xf32, #tpu.memory_space<vmem>>, vector<64x128xf32>
    %cst_12 = arith.constant dense<0.000000e+00> : vector<8x128xf32>
    %9 = tpu.matmul %7, %8, %cst_12 {dimension_numbers = #tpu.dot_dimension_numbers<[1], [0], [0], [1], [0, 0, 1, 1], [], []>} : vector<8x64xf32>, vector<64x128xf32>, vector<8x128xf32> -> vector<8x128xf32>
    %10 = arith.addf %6, %9 : vector<8x128xf32>
    %cst_13 = arith.constant dense<0.000000e+00> : vector<128xf32>
    %11 = vector.multi_reduction <add>, %10, %cst_13 [0] : vector<8x128xf32> to vector<128xf32>
    %12 = vector.shape_cast %11 : vector<128xf32> to vector<1x128xf32>
    %cst_14 = arith.constant 1.250000e-01 : f32
    %13 = vector.broadcast %cst_14 : f32 to vector<1x128xf32>
    %14 = arith.mulf %12, %13 : vector<1x128xf32>
    %15 = arith.mulf %10, %10 : vector<8x128xf32>
    %cst_15 = arith.constant dense<0.000000e+00> : vector<128xf32>
    %16 = vector.multi_reduction <add>, %15, %cst_15 [0] : vector<8x128xf32> to vector<128xf32>
    %17 = vector.shape_cast %16 : vector<128xf32> to vector<1x128xf32>
    %cst_16 = arith.constant 1.250000e-01 : f32
    %18 = vector.broadcast %cst_16 : f32 to vector<1x128xf32>
    %19 = arith.mulf %17, %18 : vector<1x128xf32>
    %20 = arith.mulf %14, %14 : vector<1x128xf32>
    %21 = arith.subf %19, %20 : vector<1x128xf32>
    %cst_17 = arith.constant 9.99999974E-6 : f32
    %22 = vector.broadcast %cst_17 : f32 to vector<1x128xf32>
    %23 = arith.addf %21, %22 : vector<1x128xf32>
    %24 = math.rsqrt %23 : vector<1x128xf32>
    %25 = arith.mulf %24, %0 : vector<1x128xf32>
    %26 = vector.broadcast %14 : vector<1x128xf32> to vector<8x128xf32>
    %27 = arith.subf %10, %26 : vector<8x128xf32>
    %28 = vector.broadcast %25 : vector<1x128xf32> to vector<8x128xf32>
    %29 = arith.mulf %27, %28 : vector<8x128xf32>
    %30 = vector.broadcast %1 : vector<1x128xf32> to vector<8x128xf32>
    %31 = arith.addf %29, %30 : vector<8x128xf32>
    %cst_18 = arith.constant 0.000000e+00 : f32
    %32 = vector.broadcast %cst_18 : f32 to vector<8x128xf32>
    %33 = arith.maximumf %31, %32 : vector<8x128xf32>
    %c0_19 = arith.constant 0 : index
    %c0_20 = arith.constant 0 : index
    %34 = vector.load %arg5[%c0_19, %c0_20] : memref<128x128xf32, #tpu.memory_space<vmem>>, vector<128x128xf32>
    %cst_21 = arith.constant dense<0.000000e+00> : vector<8x128xf32>
    %35 = tpu.matmul %33, %34, %cst_21 {dimension_numbers = #tpu.dot_dimension_numbers<[1], [0], [0], [1], [0, 0, 1, 1], [], []>} : vector<8x128xf32>, vector<128x128xf32>, vector<8x128xf32> -> vector<8x128xf32>
    %cst_22 = arith.constant dense<0.000000e+00> : vector<128xf32>
    %36 = vector.multi_reduction <add>, %35, %cst_22 [0] : vector<8x128xf32> to vector<128xf32>
    %37 = vector.shape_cast %36 : vector<128xf32> to vector<1x128xf32>
    %cst_23 = arith.constant 1.250000e-01 : f32
    %38 = vector.broadcast %cst_23 : f32 to vector<1x128xf32>
    %39 = arith.mulf %37, %38 : vector<1x128xf32>
    %40 = arith.mulf %35, %35 : vector<8x128xf32>
    %cst_24 = arith.constant dense<0.000000e+00> : vector<128xf32>
    %41 = vector.multi_reduction <add>, %40, %cst_24 [0] : vector<8x128xf32> to vector<128xf32>
    %42 = vector.shape_cast %41 : vector<128xf32> to vector<1x128xf32>
    %cst_25 = arith.constant 1.250000e-01 : f32
    %43 = vector.broadcast %cst_25 : f32 to vector<1x128xf32>
    %44 = arith.mulf %42, %43 : vector<1x128xf32>
    %45 = arith.mulf %39, %39 : vector<1x128xf32>
    %46 = arith.subf %44, %45 : vector<1x128xf32>
    %cst_26 = arith.constant 9.99999974E-6 : f32
    %47 = vector.broadcast %cst_26 : f32 to vector<1x128xf32>
    %48 = arith.addf %46, %47 : vector<1x128xf32>
    %49 = math.rsqrt %48 : vector<1x128xf32>
    %50 = arith.mulf %49, %2 : vector<1x128xf32>
    %51 = vector.broadcast %39 : vector<1x128xf32> to vector<8x128xf32>
    %52 = arith.subf %35, %51 : vector<8x128xf32>
    %53 = vector.broadcast %50 : vector<1x128xf32> to vector<8x128xf32>
    %54 = arith.mulf %52, %53 : vector<8x128xf32>
    %55 = vector.broadcast %3 : vector<1x128xf32> to vector<8x128xf32>
    %56 = arith.addf %54, %55 : vector<8x128xf32>
    %c0_27 = arith.constant 0 : index
    %c0_28 = arith.constant 0 : index
    %57 = vector.load %arg7[%c0_27, %c0_28] : memref<8x128xf32, #tpu.memory_space<vmem>>, vector<8x128xf32>
    tpu.vector_store %arg7[%c0_27, %c0_28], %56 {strides = array<i32>} : memref<8x128xf32, #tpu.memory_space<vmem>>, vector<8x128xf32>,
    return
  }
  func.func @transform_0(%arg0: i32) -> (i32, i32) {
    %c0_i32 = arith.constant 0 : i32
    %c0_i32_0 = arith.constant 0 : i32
    %c0_i32_1 = arith.constant 0 : i32
    return %c0_i32, %c0_i32_0 : i32, i32
  }
  func.func @transform_1(%arg0: i32) -> (i32, i32) {
    %c0_i32 = arith.constant 0 : i32
    %c0_i32_0 = arith.constant 0 : i32
    %c0_i32_1 = arith.constant 0 : i32
    return %c0_i32, %c0_i32_0 : i32, i32
  }
  func.func @transform_2(%arg0: i32) -> (i32, i32) {
    %c0_i32 = arith.constant 0 : i32
    %c0_i32_0 = arith.constant 0 : i32
    %c0_i32_1 = arith.constant 0 : i32
    return %c0_i32, %c0_i32_0 : i32, i32
  }
  func.func @transform_3(%arg0: i32) -> (i32, i32) {
    %c0_i32 = arith.constant 0 : i32
    %c0_i32_0 = arith.constant 0 : i32
    %c0_i32_1 = arith.constant 0 : i32
    return %c0_i32, %c0_i32_0 : i32, i32
  }
  func.func @transform_4(%arg0: i32) -> (i32, i32) {
    %c0_i32 = arith.constant 0 : i32
    %c0_i32_0 = arith.constant 0 : i32
    %c0_i32_1 = arith.constant 0 : i32
    return %c0_i32, %c0_i32_0 : i32, i32
  }
  func.func @transform_5(%arg0: i32) -> (i32, i32) {
    %c0_i32 = arith.constant 0 : i32
    %c0_i32_0 = arith.constant 0 : i32
    %c0_i32_1 = arith.constant 0 : i32
    return %c0_i32, %c0_i32_0 : i32, i32
  }
  func.func @transform_6(%arg0: i32) -> (i32, i32) {
    %c0_i32 = arith.constant 0 : i32
    %c0_i32_0 = arith.constant 0 : i32
    %c0_i32_1 = arith.constant 0 : i32
    return %c0_i32, %c0_i32_0 : i32, i32
  }
}

</mosaic_0001>

<bundles_post_ra>
// kernel: tpu_custom_call.1
= control target key start
LH: loop header
LB: loop body
LE: loop exit
PB: predicated region body
PF: predicated region fallthrough
CT: control target
= control target key end

     0   :  { %11 = vsyncpa [#allocation3], 0  ;;  %s802_s0 = inlined_call_operand.hbm [shape: f32[8,64], index: 0, kind: input, shape index: {}]   ;;  %s803_s1 = inlined_call_operand.hbm [shape: f32[8,64], index: 1, kind: input, shape index: {}]   ;;  %s804_s2 = inlined_call_operand.hbm [shape: f32[64,128], index: 2, kind: input, shape index: {}]   ;;  %s805_s3 = inlined_call_operand.hbm [shape: f32[64,128], index: 3, kind: input, shape index: {}]   ;;  %s806_s4 = inlined_call_operand.hbm [shape: f32[128,128], index: 4, kind: input, shape index: {}]   ;;  %s807_s5 = inlined_call_operand.vmem [shape: f32[4,128], index: 5, kind: input, shape index: {}]   ;;  %s808_s6 = inlined_call_operand.hbm [shape: f32[8,128], index: 6, kind: output, shape index: {}]  }
   0x1   :  { %12 = vsyncpa [#allocation6], 0 }
   0x2   :  { %13 = vsyncpa [#allocation9], 0 }
   0x3   :  { %14 = vsyncpa [#allocation4], 0  ;;  %s678_s21 = smov [#allocation5]  }
   0x4   :  { %s31_s22 = sshll.u32 %s678_s21, 4  ;;  %s32_s22 = int_to_ptr.vmem [resolvable:$true] %s31_s22 }
   0x5   :  { %s558_s23 = scalar_lea.vmem %s32_s22, 128  ;;  %p563_p1 = scmp.lt.s32.totalorder %s32_s22, %s32_s22 }
   0x6   :  { %p559_p0 = scmp.ne.s32.totalorder %s32_s22, %s558_s23  ;;  %p564_p2 = scmp.lt.s32.totalorder %s558_s23, %s558_s23 }
   0x8   :  { %p565_p3 = por %p564_p2, %p563_p1 }
   0xa   :  { %p566_p4 = pnand %p565_p3, %p559_p0 }
   0xc   :  { %569 = shalt.err (!%p566_p4)
}
   0xd   :  { %34 = dma.hbm_to_vmem [thread:$0]  %s803_s1, 128, %s32_s22, [#allocation6]  }
   0xe   :  { %s679_s26 = smov [#allocation8]   ;;  %s680_s28 = smov [#allocation2]  }
   0xf   :  { %s52_s27 = sshll.u32 %s679_s26, 4  ;;  %s21_s29 = sshll.u32 %s680_s28, 4  ;;  %s53_s27 = int_to_ptr.vmem [resolvable:$true] %s52_s27  ;;  %s22_s29 = int_to_ptr.vmem [resolvable:$true] %s21_s29 }
  0x10   :  { %s578_s30 = scalar_lea.vmem %s53_s27, 1024  ;;  %p583_p6 = scmp.lt.s32.totalorder %s53_s27, %s53_s27 }
  0x11   :  { %p579_p5 = scmp.ne.s32.totalorder %s53_s27, %s578_s30  ;;  %p584_p7 = scmp.lt.s32.totalorder %s578_s30, %s578_s30 }
  0x13   :  { %p585_p8 = por %p584_p7, %p583_p6 }
  0x15   :  { %p586_p9 = pnand %p585_p8, %p579_p5 }
  0x17   :  { %589 = shalt.err (!%p586_p9)
}
  0x18   :  { %s681_s7 = smov 128   ;;  %s682_s8 = smov 8  }
  0x19   :  { %58 = dma.hbm_to_vmem [thread:$0]  %s805_s3, 1024, %s53_s27, [#allocation9], %s681_s7, %s681_s7, %s682_s8  }
  0x1a   :  { %s598_s1 = scalar_lea.vmem %s22_s29, 128  ;;  %p603_p11 = scmp.lt.s32.totalorder %s22_s29, %s22_s29 }
  0x1b   :  { %p599_p10 = scmp.ne.s32.totalorder %s22_s29, %s598_s1  ;;  %p604_p12 = scmp.lt.s32.totalorder %s598_s1, %s598_s1 }
  0x1d   :  { %p605_p13 = por %p604_p12, %p603_p11 }
  0x1f   :  { %p606_p0 = pnand %p605_p13, %p599_p10 }
  0x21   :  { %609 = shalt.err (!%p606_p0)
}
  0x22   :  { %24 = dma.hbm_to_vmem [thread:$0]  %s802_s0, 128, %s22_s29, [#allocation3]  }
  0x23   :  { %s683_s13 = smov [#allocation7]   ;;  %s684_s15 = smov [#allocation10]  }
  0x24   :  { %s40_s14 = sshll.u32 %s683_s13, 4  ;;  %s64_s16 = sshll.u32 %s684_s15, 4  ;;  %s41_s14 = int_to_ptr.vmem [resolvable:$true] %s40_s14  ;;  %s65_s16 = int_to_ptr.vmem [resolvable:$true] %s64_s16 }
  0x25   :  { %s618_s17 = scalar_lea.vmem %s41_s14, 1024  ;;  %p623_p2 = scmp.lt.s32.totalorder %s41_s14, %s41_s14 }
  0x26   :  { %p619_p1 = scmp.ne.s32.totalorder %s41_s14, %s618_s17  ;;  %p624_p3 = scmp.lt.s32.totalorder %s618_s17, %s618_s17 }
  0x28   :  { %p625_p4 = por %p624_p3, %p623_p2 }
  0x2a   :  { %p626_p5 = pnand %p625_p4, %p619_p1 }
  0x2c   :  { %629 = shalt.err (!%p626_p5)
}
  0x2d   :  { %46 = dma.hbm_to_vmem [thread:$0]  %s804_s2, 1024, %s41_s14, [#allocation6], %s681_s7, %s681_s7, %s682_s8  }
  0x2e   :  { %s638_s0 = scalar_lea.vmem %s65_s16, 2048  ;;  %p643_p7 = scmp.lt.s32.totalorder %s65_s16, %s65_s16 }
  0x2f   :  { %p639_p6 = scmp.ne.s32.totalorder %s65_s16, %s638_s0  ;;  %p644_p8 = scmp.lt.s32.totalorder %s638_s0, %s638_s0 }
  0x31   :  { %p645_p9 = por %p644_p8, %p643_p7 }
  0x33   :  { %p646_p10 = pnand %p645_p9, %p639_p6 }
  0x35   :  { %649 = shalt.err (!%p646_p10)
}
  0x36   :  { %70 = dma.hbm_to_vmem [thread:$0]  %s806_s4, 2048, %s65_s16, [#allocation9], %s681_s7, %s681_s7, %s682_s8  }
  0x37   :  { %670 = dma.done.wait [#allocation3], 128  }
  0x38   :  { %671 = vsyncadd [#allocation3], 4294967168 }
  0x39   :  { %672 = dma.done.wait [#allocation6], 1152  }
  0x3a   :  { %673 = vsyncadd [#allocation6], 4294966144 }
  0x3b   :  { %674 = dma.done.wait [#allocation9], 3072  }
  0x3c   :  { %675 = vsyncadd [#allocation9], 4294964224  ;;  %v685_v0 = vmov 0.0   ;;  %vm686_vm0 = vmmov 0   ;;  %v109_v1 = vld [vmem:[#allocation8 + $0x38] sm:$0xff]  ;;  %v108_v2 = vld [vmem:[#allocation8 + $0x30] sm:$0xff]  ;;  %v278_v58 = vlaneseq }
  0x3d   :  { %463 = vmatprep.subr.mxu1 %v685_v0  ;;  %479 = vmatprep.mubr.msk.f32.mxu1 %vm686_vm0, %v685_v0  ;;  %v107_v3 = vld [vmem:[#allocation8 + $0x28] sm:$0xff]  ;;  %v106_v4 = vld [vmem:[#allocation8 + $0x20] sm:$0xff]  ;;  %v105_v5 = vld [vmem:[#allocation8 + $0x18] sm:$0xff]  ;;  %vm110_vm1 = vcmask 523264   ;;  %s687_s27 = smov [#allocation11]  }
  0x3e   :  { %501 = vmatprep.subr.mxu0 %v685_v0  ;;  %533 = vmatprep.mubr.msk.f32.mxu0 %vm686_vm0, %v685_v0  ;;  %v104_v6 = vld [vmem:[#allocation8 + $0x10] sm:$0xff]  ;;  %v103_v7 = vld [vmem:[#allocation8 + $0x8] sm:$0xff]  ;;  %v102_v8 = vld [vmem:[#allocation8] sm:$0xff]  ;;  %v279_v59 = vshrl.u32 %v278_v58, 7  ;;  %s413_s28 = sshll.u32 %s687_s27, 4  ;;  %s414_s28 = int_to_ptr.vmem [resolvable:$true] %s413_s28 }
  0x3f   :  { %464 = vmatpush3.msra.mxu1 %v109_v1  ;;  %v101_v9 = vld [vmem:[#allocation5] sm:$0xff]  ;;  %v99_v11 = vld [vmem:[#allocation7 + $0x30] sm:$0xff]  ;;  %v98_v12 = vld [vmem:[#allocation7 + $0x28] sm:$0xff]  ;;  %s650_s29 = scalar_lea.vmem %s414_s28, 128  ;;  %p655_p12 = scmp.lt.s32.totalorder %s414_s28, %s414_s28 }
  0x40   :  { %465 = vmatprep.subr.mxu1 %v685_v0  ;;  %v100_v10 = vld [vmem:[#allocation7 + $0x38] sm:$0xff]  ;;  %v97_v13 = vld [vmem:[#allocation7 + $0x20] sm:$0xff]  ;;  %v95_v15 = vld [vmem:[#allocation7 + $0x10] sm:$0xff]  ;;  %v280_v61 = vsub.s32 0, %v279_v59  ;;  %p651_p11 = scmp.ne.s32.totalorder %s414_s28, %s650_s29  ;;  %p656_p13 = scmp.lt.s32.totalorder %s650_s29, %s650_s29 }
  0x41   :  { %466 = vmatpush3.msra.mxu1 %v108_v2  ;;  %v96_v14 = vld [vmem:[#allocation7 + $0x18] sm:$0xff]  ;;  %v94_v16 = vld [vmem:[#allocation7 + $0x8] sm:$0xff]  ;;  %v93_v17 = vld [vmem:[#allocation7] sm:$0xff] }
  0x42   :  { %467 = vmatprep.subr.mxu1 %v685_v0  ;;  %v92_v18 = vld [vmem:[#allocation2] sm:$0xff]  ;;  %v304_v19 = vld [vmem:[#allocation10 + $0x78] sm:$0xff]  ;;  %v302_v21 = vld [vmem:[#allocation10 + $0x68] sm:$0xff]  ;;  %p657_p0 = por %p656_p13, %p655_p12 }
  0x43   :  { %468 = vmatpush3.msra.mxu1 %v107_v3  ;;  %502 = vmatpush3.msra.mxu0 %v304_v19  ;;  %v303_v20 = vld [vmem:[#allocation10 + $0x70] sm:$0xff]  ;;  %v301_v22 = vld [vmem:[#allocation10 + $0x60] sm:$0xff]  ;;  %v300_v23 = vld [vmem:[#allocation10 + $0x58] sm:$0xff] }
  0x44   :  { %469 = vmatprep.subr.mxu1 %v685_v0  ;;  %503 = vmatprep.subr.mxu0 %v685_v0  ;;  %v299_v24 = vld [vmem:[#allocation10 + $0x50] sm:$0xff]  ;;  %v298_v25 = vld [vmem:[#allocation10 + $0x48] sm:$0xff]  ;;  %v297_v26 = vld [vmem:[#allocation10 + $0x40] sm:$0xff]  ;;  %p658_p1 = pnand %p657_p0, %p651_p11 }
  0x45   :  { %470 = vmatpush3.msra.mxu1 %v106_v4  ;;  %504 = vmatpush3.msra.mxu0 %v303_v20  ;;  %v296_v27 = vld [vmem:[#allocation10 + $0x38] sm:$0xff]  ;;  %v295_v28 = vld [vmem:[#allocation10 + $0x30] sm:$0xff]  ;;  %v294_v29 = vld [vmem:[#allocation10 + $0x28] sm:$0xff] }
  0x46   :  { %471 = vmatprep.subr.mxu1 %v685_v0  ;;  %505 = vmatprep.subr.mxu0 %v685_v0  ;;  %v293_v30 = vld [vmem:[#allocation10 + $0x20] sm:$0xff]  ;;  %v292_v31 = vld [vmem:[#allocation10 + $0x18] sm:$0xff]  ;;  %v291_v32 = vld [vmem:[#allocation10 + $0x10] sm:$0xff] }
  0x47   :  { %472 = vmatpush3.msra.mxu1 %v105_v5  ;;  %506 = vmatpush3.msra.mxu0 %v302_v21  ;;  %v290_v33 = vld [vmem:[#allocation10 + $0x8] sm:$0xff]  ;;  %v289_v34 = vld [vmem:[#allocation10] sm:$0xff]  ;;  %v88_v60 = vld [vmem:[%s807_s5] sm:$0x1] }
  0x48   :  { %473 = vmatprep.subr.mxu1 %v685_v0  ;;  %507 = vmatprep.subr.mxu0 %v685_v0  ;;  %v426_v2 = vld [vmem:[%s807_s5 + $0x1] ss:$0 sm:$0xff] }
  0x49   :  { %474 = vmatpush3.msra.mxu1 %v104_v6  ;;  %508 = vmatpush3.msra.mxu0 %v301_v22 }
  0x4a   :  { %475 = vmatprep.subr.mxu1 %v685_v0  ;;  %509 = vmatprep.subr.mxu0 %v685_v0 }
  0x4b   :  { %476 = vmatpush3.msra.mxu1 %v103_v7  ;;  %510 = vmatpush3.msra.mxu0 %v300_v23 }
  0x4c   :  { %477 = vmatprep.subr.mxu1 %v685_v0  ;;  %511 = vmatprep.subr.mxu0 %v685_v0 }
  0x4d   :  { %478 = vmatpush3.msra.mxu1 %v102_v8  ;;  %512 = vmatpush3.msra.mxu0 %v299_v24 }
  0x4e   :  { %480 = vmatmul.mubr.msk.f32.vlgmr.msra.gmra.mxu1 %vm110_vm1, %v101_v9  ;;  %482 = vmatprep.subr.mxu1 %v685_v0 }
  0x4f   :  { %483 = vmatpush3.msra.mxu1 %v100_v10  ;;  %498 = vmatprep.mubr.msk.f32.mxu1 %vm686_vm0, %v685_v0 }
  0x50   :  { %484 = vmatprep.subr.mxu1 %v685_v0  ;;  %513 = vmatprep.subr.mxu0 %v685_v0 }
  0x51   :  { %485 = vmatpush3.msra.mxu1 %v99_v11  ;;  %514 = vmatpush3.msra.mxu0 %v298_v25 }
  0x52   :  { %486 = vmatprep.subr.mxu1 %v685_v0  ;;  %515 = vmatprep.subr.mxu0 %v685_v0 }
  0x53   :  { %487 = vmatpush3.msra.mxu1 %v98_v12  ;;  %516 = vmatpush3.msra.mxu0 %v297_v26  ;;  %v90_v26 = vld [vmem:[%s807_s5 + $0x2] sm:$0x1] }
  0x54   :  { %488 = vmatprep.subr.mxu1 %v685_v0  ;;  %517 = vmatprep.subr.mxu0 %v685_v0 }
  0x55   :  { %489 = vmatpush3.msra.mxu1 %v97_v13  ;;  %518 = vmatpush3.msra.mxu0 %v296_v27 }
  0x56   :  { %490 = vmatprep.subr.mxu1 %v685_v0  ;;  %519 = vmatprep.subr.mxu0 %v685_v0 }
  0x57   :  { %491 = vmatpush3.msra.mxu1 %v96_v14  ;;  %520 = vmatpush3.msra.mxu0 %v295_v28 }
  0x58   :  { %492 = vmatprep.subr.mxu1 %v685_v0  ;;  %521 = vmatprep.subr.mxu0 %v685_v0 }
  0x59   :  { %493 = vmatpush3.msra.mxu1 %v95_v15  ;;  %522 = vmatpush3.msra.mxu0 %v294_v29 }
  0x5a   :  { %494 = vmatprep.subr.mxu1 %v685_v0  ;;  %523 = vmatprep.subr.mxu0 %v685_v0 }
  0x5b   :  { %495 = vmatpush3.msra.mxu1 %v94_v16  ;;  %524 = vmatpush3.msra.mxu0 %v293_v30 }
  0x5c   :  { %496 = vmatprep.subr.mxu1 %v685_v0  ;;  %525 = vmatprep.subr.mxu0 %v685_v0 }
  0x5d   :  { %497 = vmatpush3.msra.mxu1 %v93_v17  ;;  %526 = vmatpush3.msra.mxu0 %v292_v31  ;;  %v427_v31 = vld [vmem:[%s807_s5 + $0x3] ss:$0 sm:$0xff] }
  0x5e   :  { %499 = vmatmul.mubr.msk.f32.vlgmr.msra.gmra.mxu1 %vm110_vm1, %v92_v18  ;;  %527 = vmatprep.subr.mxu0 %v685_v0 }
  0x5f   :  { %528 = vmatpush3.msra.mxu0 %v291_v32 }
  0x60   :  { %529 = vmatprep.subr.mxu0 %v685_v0 }
  0x61   :  { %530 = vmatpush3.msra.mxu0 %v290_v33 }
  0x62   :  { %531 = vmatprep.subr.mxu0 %v685_v0 }
  0x63   :  { %532 = vmatpush3.msra.mxu0 %v289_v34 }
 0x10e   :  { %v180_v35 = vpop.f32.mrf.mxu1 }
 0x110   :  { %v481_v36 = vpop.f32.mrf.mxu1 }
 0x11e   :  { %v253_v37 = vpop.f32.mrf.mxu1 }
 0x11f   :  { %v254_v38 = vadd.f32 %v253_v37, %v180_v35 }
 0x120   :  { %v500_v39 = vpop.f32.mrf.mxu1 }
 0x121   :  { %v257_v40 = vrot.slane %v254_v38, 4  ;;  %v264_v41 = vmul.f32 %v254_v38, %v254_v38 }
 0x123   :  { %v258_v42 = vadd.f32 %v257_v40, %v254_v38  ;;  %v265_v43 = vrot.slane %v264_v41, 4 }
 0x125   :  { %v259_v44 = vrot.slane %v258_v42, 2  ;;  %v266_v45 = vadd.f32 %v265_v43, %v264_v41 }
 0x127   :  { %v260_v46 = vadd.f32 %v259_v44, %v258_v42  ;;  %v267_v47 = vrot.slane %v266_v45, 2 }
 0x129   :  { %v261_v48 = vrot.slane %v260_v46, 1  ;;  %v268_v49 = vadd.f32 %v267_v47, %v266_v45 }
 0x12b   :  { %v269_v50 = vrot.slane %v268_v49, 1  ;;  %v262_v51 = vadd.f32 %v261_v48, %v260_v46 }
 0x12d   :  { %v270_v52 = vadd.f32 %v269_v50, %v268_v49  ;;  %v263_v53 = vmul.f32 0.125, %v262_v51 }
 0x12f   :  { %v271_v54 = vmul.f32 0.125, %v270_v52  ;;  %v272_v55 = vmul.f32 %v263_v53, %v263_v53  ;;  %v277_v0 = vsub.f32 %v254_v38, %v263_v53 }
 0x131   :  { %v273_v56 = vsub.f32 %v271_v54, %v272_v55 }
 0x133   :  { %v274_v57 = vadd.f32 1e-05, %v273_v56 }
 0x135   :  { %546 = vrsqrt.f32 %v274_v57 }
 0x142   :  { %v547_v62 = vpop.eup %546 }
 0x143   :  { %v276_v63 = vmul.f32 %v547_v62, %v88_v60 }
 0x145   :  { %v281_v1 = vrot.slane %v276_v63, %v280_v61 }
 0x147   :  { %v282_v3 = vmul.f32 %v281_v1, %v277_v0 }
 0x149   :  { %v287_v4 = vadd.f32 %v426_v2, %v282_v3 }
 0x14b   :  { %v288_v5 = vmax.f32 %v287_v4, 0.0 }
 0x14d   :  { %534 = vmatmul.mubr.f32.vlgmr.msra.gmra.mxu0 %v288_v5 }
 0x20d   :  { %v371_v6 = vpop.f32.mrf.mxu0 }
 0x20e   :  { %v375_v7 = vrot.slane %v371_v6, 4  ;;  %v382_v8 = vmul.f32 %v371_v6, %v371_v6 }
 0x20f   :  { %v535_v9 = vpop.f32.mrf.mxu0 }
 0x210   :  { %v376_v10 = vadd.f32 %v375_v7, %v371_v6  ;;  %v383_v11 = vrot.slane %v382_v8, 4 }
 0x212   :  { %v377_v12 = vrot.slane %v376_v10, 2  ;;  %v384_v13 = vadd.f32 %v383_v11, %v382_v8 }
 0x214   :  { %v378_v14 = vadd.f32 %v377_v12, %v376_v10  ;;  %v385_v15 = vrot.slane %v384_v13, 2 }
 0x216   :  { %v379_v16 = vrot.slane %v378_v14, 1  ;;  %v386_v17 = vadd.f32 %v385_v15, %v384_v13 }
 0x218   :  { %v380_v18 = vadd.f32 %v379_v16, %v378_v14  ;;  %v387_v19 = vrot.slane %v386_v17, 1 }
 0x21a   :  { %v381_v20 = vmul.f32 0.125, %v380_v18  ;;  %v388_v21 = vadd.f32 %v387_v19, %v386_v17 }
 0x21c   :  { %v389_v22 = vmul.f32 0.125, %v388_v21  ;;  %v390_v23 = vmul.f32 %v381_v20, %v381_v20  ;;  %v395_v29 = vsub.f32 %v371_v6, %v381_v20 }
 0x21e   :  { %v391_v24 = vsub.f32 %v389_v22, %v390_v23 }
 0x220   :  { %v392_v25 = vadd.f32 1e-05, %v391_v24 }
 0x222   :  { %548 = vrsqrt.f32 %v392_v25 }
 0x22f   :  { %v549_v27 = vpop.eup %548 }
 0x230   :  { %v394_v28 = vmul.f32 %v549_v27, %v90_v26 }
 0x232   :  { %v399_v30 = vrot.slane %v394_v28, %v280_v61 }
 0x234   :  { %v400_v32 = vmul.f32 %v399_v30, %v395_v29 }
 0x236   :  { %v405_v33 = vadd.f32 %v427_v31, %v400_v32 }
 0x238   :  { %406 = vst [vmem:[#allocation11] sm:$0xff] %v405_v33 }
 0x239   :  { %661 = shalt.err (!%p658_p1)
}
 0x23a   :  { %416 = dma.vmem_to_hbm [thread:$0]  %s414_s28, 128, %s808_s6, [#allocation4]  }
 0x23b   :  { %676 = dma.done.wait [#allocation4], 128  }
 0x23c   :  { %677 = vsyncadd [#allocation4], 4294967168 }
 0x23d   :  { %420 = vsyncpa [#allocation3], 1 }
 0x23e   :  { %421 = vsyncpa [#allocation6], 1 }
 0x23f   :  { %422 = vsyncpa [#allocation9], 1 }
 0x240   :  { %423 = vsyncpa [#allocation4], 1 }

</bundles_post_ra>
